<compile_context>
chip_gen: v6e
topology: v6e:2x2x1
jax: 0.10.0
libtpu: 0.0.40
codegen_flags: <defaults>
</compile_context>

<pallas_src>
import jax
import jax.numpy as jnp
from jax.experimental import pallas as pl
from jax.experimental.pallas import tpu as pltpu


def _denorm_kernel(x_ref, scale_ref, offset_ref, o_ref):
    # x_ref: (TM, TW); scale_ref/offset_ref: (TM, 1) f32, broadcast over lanes.
    x = x_ref[...].astype(jnp.float32)
    o_ref[...] = (x * scale_ref[...] + offset_ref[...]).astype(o_ref.dtype)


def _choose_tiles(rows, lanes):
    # Row tile: either the full row extent or a multiple of 8.
    tm = rows if rows <= 512 else 512
    # Lane tile: either the full lane extent or a multiple of 128.
    tw = lanes if lanes <= 2048 else 2048
    return tm, tw


def denormalize(x, std_c, mean_c, to_pixel_space=True):
    """x: (N, C, H, W); std_c/mean_c: per-channel (C,) vectors."""
    N, C, H, W = x.shape
    assert std_c.shape == (C,) and mean_c.shape == (C,)

    # Static Python scale, folded into the constants on the host.
    scale = 255.0 if to_pixel_space else 1.0

    rows, lanes = N * C, H * W
    x2 = x.reshape(rows, lanes)

    # Per-row scale/offset (row r corresponds to channel r % C).  f32 so the
    # arithmetic stays in f32 even for bf16 inputs.
    row_scale = jnp.tile(std_c.astype(jnp.float32) * scale, N).reshape(rows, 1)
    row_offset = jnp.tile(mean_c.astype(jnp.float32) * scale, N).reshape(rows, 1)

    tm, tw = _choose_tiles(rows, lanes)
    grid = (pl.cdiv(rows, tm), pl.cdiv(lanes, tw))

    x_spec = pl.BlockSpec((tm, tw), lambda i, j: (i, j))
    # Same block index across the inner (lane) axis -> constants stay resident.
    const_spec = pl.BlockSpec((tm, 1), lambda i, j: (i, 0))
    out_spec = pl.BlockSpec((tm, tw), lambda i, j: (i, j))

    out2 = pl.pallas_call(
        _denorm_kernel,
        out_shape=jax.ShapeDtypeStruct((rows, lanes), x.dtype),
        grid_spec=pltpu.PrefetchScalarGridSpec(
            num_scalar_prefetch=0,
            grid=grid,
            in_specs=[x_spec, const_spec, const_spec],
            out_specs=out_spec,
        ),
        compiler_params=pltpu.CompilerParams(
            dimension_semantics=("parallel", "parallel")
        ),
    )(x2, row_scale, row_offset)

    return out2.reshape(N, C, H, W)


def make_denormalizer_params(input_size, mean, std, dtype=jnp.float32):
    """Replicates Denormalizer.__init__ semantics with per-channel scalars
    (the full (1, C, H, W) constant planes are mathematically redundant)."""
    assert input_size > 0
    assert len(mean) > 0 and len(mean) == len(std)
    mean_c = jnp.asarray(mean, dtype=dtype)  # (C,)
    std_c = jnp.asarray(std, dtype=dtype)    # (C,)
    return mean_c, std_c


if __name__ == "__main__":
    # Small deterministic example: batch=2, channels=4, spatial=16.
    N, C, H = 2, 4, 16
    input_size = H
    mean = tuple(0.4 + 0.05 * i for i in range(C))   # deterministic per-channel means
    std = tuple(0.2 + 0.02 * i for i in range(C))    # deterministic per-channel stds

    mean_c, std_c = make_denormalizer_params(input_size, mean, std)

    key = jax.random.PRNGKey(0)
    x = jax.random.uniform(key, (N, C, H, H), dtype=jnp.float32)  # scales in [0, 1]

    out = denormalize(x, std_c, mean_c, to_pixel_space=True)
    out = jax.block_until_ready(out)

    # Reference check (plain JAX, broadcasting the per-channel constants).
    ref = (x * std_c.reshape(1, C, 1, 1) + mean_c.reshape(1, C, 1, 1)) * 255.0
    assert out.shape == x.shape
    assert jnp.allclose(out, ref, atol=1e-4, rtol=1e-5)

    # Also check to_pixel_space=False path (no 255 scaling).
    out2 = jax.block_until_ready(denormalize(x, std_c, mean_c, to_pixel_space=False))
    ref2 = x * std_c.reshape(1, C, 1, 1) + mean_c.reshape(1, C, 1, 1)
    assert jnp.allclose(out2, ref2, atol=1e-5, rtol=1e-5)

    print("KERNEL_OK")
</pallas_src>

<mosaic_0001>
module attributes {stable_mosaic.version = 11 : i64} {
  func.func @_denorm_kernel(%arg0: i32, %arg1: i32, %arg2: memref<8x256xf32, #tpu.memory_space<vmem>>, %arg3: memref<8x1xf32, #tpu.memory_space<vmem>>, %arg4: memref<8x1xf32, #tpu.memory_space<vmem>>, %arg5: memref<8x256xf32, #tpu.memory_space<vmem>>) attributes {dimension_semantics = [#tpu.dimension_semantics<parallel>, #tpu.dimension_semantics<parallel>], iteration_bounds = array<i64: 1, 1>, scalar_prefetch = 0 : i64, scratch_operands = 0 : i64, tpu.core_type = #tpu.core_type<tc>, window_params = [{transform_indices = @transform_0, window_bounds = array<i64: 8, 256>}, {transform_indices = @transform_1, window_bounds = array<i64: 8, 1>}, {transform_indices = @transform_2, window_bounds = array<i64: 8, 1>}, {transform_indices = @transform_3, window_bounds = array<i64: 8, 256>}]} {
    %c0 = arith.constant 0 : index
    %c0_0 = arith.constant 0 : index
    %0 = vector.load %arg2[%c0, %c0_0] : memref<8x256xf32, #tpu.memory_space<vmem>>, vector<8x256xf32>
    %c0_1 = arith.constant 0 : index
    %c0_2 = arith.constant 0 : index
    %1 = vector.load %arg3[%c0_1, %c0_2] : memref<8x1xf32, #tpu.memory_space<vmem>>, vector<8x1xf32>
    %2 = vector.broadcast %1 : vector<8x1xf32> to vector<8x256xf32>
    %3 = arith.mulf %0, %2 : vector<8x256xf32>
    %c0_3 = arith.constant 0 : index
    %c0_4 = arith.constant 0 : index
    %4 = vector.load %arg4[%c0_3, %c0_4] : memref<8x1xf32, #tpu.memory_space<vmem>>, vector<8x1xf32>
    %5 = vector.broadcast %4 : vector<8x1xf32> to vector<8x256xf32>
    %6 = arith.addf %3, %5 : vector<8x256xf32>
    %c0_5 = arith.constant 0 : index
    %c0_6 = arith.constant 0 : index
    %7 = vector.load %arg5[%c0_5, %c0_6] : memref<8x256xf32, #tpu.memory_space<vmem>>, vector<8x256xf32>
    tpu.vector_store %arg5[%c0_5, %c0_6], %6 {strides = array<i32>} : memref<8x256xf32, #tpu.memory_space<vmem>>, vector<8x256xf32>,
    return
  }
  func.func @transform_0(%arg0: i32, %arg1: i32) -> (i32, i32) {
    %c0_i32 = arith.constant 0 : i32
    return %arg0, %arg1 : i32, i32
  }
  func.func @transform_1(%arg0: i32, %arg1: i32) -> (i32, i32) {
    %c0_i32 = arith.constant 0 : i32
    %c0_i32_0 = arith.constant 0 : i32
    return %arg0, %c0_i32 : i32, i32
  }
  func.func @transform_2(%arg0: i32, %arg1: i32) -> (i32, i32) {
    %c0_i32 = arith.constant 0 : i32
    %c0_i32_0 = arith.constant 0 : i32
    return %arg0, %c0_i32 : i32, i32
  }
  func.func @transform_3(%arg0: i32, %arg1: i32) -> (i32, i32) {
    %c0_i32 = arith.constant 0 : i32
    return %arg0, %arg1 : i32, i32
  }
}

</mosaic_0001>

<bundles_post_ra>
// kernel: tpu_custom_call.1
= control target key start
LH: loop header
LB: loop body
LE: loop exit
PB: predicated region body
PF: predicated region fallthrough
CT: control target
= control target key end

     0   :  { %v74_v1 = vmov 0   ;;  %s111_s0 = inlined_call_operand.vmem [shape: f32[8,256], index: 0, kind: input, shape index: {}]   ;;  %s112_s1 = inlined_call_operand.vmem [shape: f32[8,1], index: 1, kind: input, shape index: {}]   ;;  %s113_s2 = inlined_call_operand.vmem [shape: f32[8,1], index: 2, kind: input, shape index: {}]   ;;  %s114_s3 = inlined_call_operand.hbm [shape: f32[8,256], index: 3, kind: output, shape index: {}]  }
   0x1   :  { %v17_v0 = vld [vmem:[%s112_s1] sm:$0xff]  ;;  %51 = vset.pattern.permute.xlu0 %v74_v1 }
   0x2   :  { %8 = vsyncpa [#allocation3], 0  ;;  %20 = vperm.xlu0 %51, %v17_v0   ;;  %v25_v2 = vld [vmem:[%s113_s2] sm:$0xff]  ;;  %v16_v5 = vld [vmem:[%s111_s0 + $0x8] sm:$0xff]  ;;  %s75_s20 = smov [#allocation2]  }
   0x3   :  { %v15_v4 = vld [vmem:[%s111_s0] sm:$0xff]  ;;  %s41_s1 = sshll.u32 %s75_s20, 4  ;;  %s42_s1 = int_to_ptr.vmem [resolvable:$true] %s41_s1 }
   0x4   :  { %s52_s2 = scalar_lea.vmem %s42_s1, 256  ;;  %p57_p1 = scmp.lt.s32.totalorder %s42_s1, %s42_s1 }
   0x5   :  { %p53_p0 = scmp.ne.s32.totalorder %s42_s1, %s52_s2  ;;  %p58_p2 = scmp.lt.s32.totalorder %s52_s2, %s52_s2 }
   0x6   :  { %28 = vperm.xlu0 %51, %v25_v2  }
   0x7   :  { %p59_p3 = por %p58_p2, %p57_p1 }
   0x9   :  { %p60_p4 = pnand %p59_p3, %p53_p0 }
  0x7d   :  { %v21_v3 = vpop.permute.xlu0 %20 }
  0x7e   :  { %v23_v6 = vmul.f32 %v21_v3, %v15_v4  ;;  %v24_v7 = vmul.f32 %v21_v3, %v16_v5 }
  0x81   :  { %v29_v8 = vpop.permute.xlu0 %28 }
  0x82   :  { %v31_v9 = vadd.f32 %v29_v8, %v23_v6  ;;  %v32_v10 = vadd.f32 %v29_v8, %v24_v7 }
  0x84   :  { %33 = vst [vmem:[#allocation2] sm:$0xff] %v31_v9  ;;  %34 = vst [vmem:[#allocation2 + $0x8] sm:$0xff] %v32_v10 }
  0x85   :  { %63 = shalt.err (!%p60_p4)
}
  0x86   :  { %44 = dma.vmem_to_hbm [thread:$0]  %s42_s1, 256, %s114_s3, [#allocation3]  }
  0x87   :  { %72 = dma.done.wait [#allocation3], 256  }
  0x88   :  { %73 = vsyncadd [#allocation3], 4294967040 }
  0x89   :  { %48 = vsyncpa [#allocation3], 1 }

</bundles_post_ra>
